<compile_context>
chip_gen: v7x
topology: tpu7x:2x2x1
jax: 0.10.0
libtpu: 0.0.40
codegen_flags: <defaults>
</compile_context>

<pallas_src>
import functools

import jax
import jax.numpy as jnp
from jax.experimental import pallas as pl
from jax.experimental.pallas import tpu as pltpu

_LANES = 128
_SUBLANES = 8


def _cdiv(a, b):
    return -(-a // b)


def _round_up(a, b):
    return _cdiv(a, b) * b


def _int_pow(t, n):
    """t**n for a static non-negative integer n via repeated squaring (VPU only)."""
    if n == 0:
        return jnp.ones_like(t)
    result = None
    base = t
    while n > 0:
        if n & 1:
            result = base if result is None else result * base
        n >>= 1
        if n:
            base = base * base
    return result


def _asl_kernel(x_ref, y_ref, o_ref, acc_ref, *,
                gamma_neg, gamma_pos, clip, eps, n_valid, block_rows, needs_mask):
    i = pl.program_id(1)

    # Initialize the per-core accumulator at the start of each reduction sweep.
    @pl.when(i == 0)
    def _():
        acc_ref[...] = jnp.zeros_like(acc_ref)

    x = x_ref[...].astype(jnp.float32)
    y = y_ref[...].astype(jnp.float32)

    # Sigmoid probabilities + asymmetric clip on the negative side.
    xs_pos = jax.nn.sigmoid(x)
    xs_neg = 1.0 - xs_pos
    if clip is not None and clip > 0:
        xs_neg = jnp.minimum(xs_neg + clip, 1.0)

    # y is a binarised 0/1 multi-label target, so the two BCE log terms collapse into a
    # single log of the selected probability, and pt equals that same probability.
    is_pos = y > 0.5
    prob = jnp.where(is_pos, xs_pos, xs_neg)
    loss = jnp.log(jnp.maximum(prob, eps))

    # Asymmetric focal weighting.
    if gamma_neg > 0 or gamma_pos > 0:
        one_minus_pt = 1.0 - prob
        if float(gamma_pos).is_integer() and float(gamma_neg).is_integer():
            # Integer gammas (default 4 / 1): VPU multiplies instead of exp/log pow.
            w_pos = _int_pow(one_minus_pt, int(gamma_pos))
            w_neg = _int_pow(one_minus_pt, int(gamma_neg))
            w = jnp.where(is_pos, w_pos, w_neg)
        else:
            g = jnp.where(is_pos, jnp.float32(gamma_pos), jnp.float32(gamma_neg))
            w = jnp.power(one_minus_pt, g)
        loss = loss * w

    # Zero the tail-padding elements of the flattened slab.
    if needs_mask:
        p = pl.program_id(0)
        base = (p * pl.num_programs(1) + i) * (block_rows * _LANES)
        row_ids = jax.lax.broadcasted_iota(jnp.int32, (block_rows, _LANES), 0)
        lane_ids = jax.lax.broadcasted_iota(jnp.int32, (block_rows, _LANES), 1)
        flat_idx = base + row_ids * _LANES + lane_ids
        loss = jnp.where(flat_idx < n_valid, loss, 0.0)

    # Fold rows into a vreg-shaped (8,128) accumulator: pure VPU adds, no cross-lane work.
    acc_ref[...] += jnp.sum(
        loss.reshape(block_rows // _SUBLANES, _SUBLANES, _LANES), axis=0)

    # Last step of this core's sweep: emit the negated per-core partial sums.
    @pl.when(i == pl.num_programs(1) - 1)
    def _():
        o_ref[...] = -acc_ref[...]


def asymmetric_loss(x, y, *, gamma_neg=4, gamma_pos=1, clip=0.05, eps=1e-6,
                    block_rows=2048, num_parallel=2):
    """Asymmetric multi-label loss via a Pallas TPU kernel.

    x: logits, y: binarized multi-label targets (same shape as x). Returns a scalar.
    """
    assert x.shape == y.shape, (x.shape, y.shape)
    n = int(x.size)

    # Lane-dense layout: flatten to (rows_total, 128); pad the tail (masked in-kernel).
    rows_needed = max(1, _cdiv(n, _LANES))
    rows_per_core = _cdiv(rows_needed, num_parallel)
    block_rows = _round_up(max(1, block_rows), _SUBLANES)
    block_rows = max(_SUBLANES, min(block_rows, _round_up(rows_per_core, _SUBLANES)))
    steps = max(1, _cdiv(rows_per_core, block_rows))
    rows_total = num_parallel * steps * block_rows
    n_padded = rows_total * _LANES

    xf = jnp.ravel(x).astype(jnp.float32)
    yf = jnp.ravel(y).astype(jnp.float32)
    pad = n_padded - n
    if pad:
        xf = jnp.pad(xf, (0, pad))
        yf = jnp.pad(yf, (0, pad))
    x2 = xf.reshape(rows_total, _LANES)
    y2 = yf.reshape(rows_total, _LANES)

    kernel = functools.partial(
        _asl_kernel,
        gamma_neg=float(gamma_neg),
        gamma_pos=float(gamma_pos),
        clip=clip,
        eps=float(eps),
        n_valid=n,
        block_rows=block_rows,
        needs_mask=(n_padded != n),
    )

    cost = pl.CostEstimate(
        flops=20 * n,
        transcendentals=3 * n,           # sigmoid (~2 EUP) + 1 log per element
        bytes_accessed=8 * n + num_parallel * _SUBLANES * _LANES * 4,
    )

    partials = pl.pallas_call(
        kernel,
        out_shape=jax.ShapeDtypeStruct((num_parallel * _SUBLANES, _LANES), jnp.float32),
        grid_spec=pltpu.PrefetchScalarGridSpec(
            num_scalar_prefetch=0,
            grid=(num_parallel, steps),
            in_specs=[
                pl.BlockSpec((block_rows, _LANES), lambda p, i: (p * steps + i, 0)),
                pl.BlockSpec((block_rows, _LANES), lambda p, i: (p * steps + i, 0)),
            ],
            out_specs=pl.BlockSpec((_SUBLANES, _LANES), lambda p, i: (p, 0)),
            scratch_shapes=[pltpu.VMEM((_SUBLANES, _LANES), jnp.float32)],
        ),
        compiler_params=pltpu.CompilerParams(
            dimension_semantics=("parallel", "arbitrary"),
        ),
        cost_estimate=cost,
    )(x2, y2)

    # Single tiny cross-lane reduction of the (already negated) per-core partials.
    return jnp.sum(partials)


def _reference(x, y, gamma_neg=4, gamma_pos=1, clip=0.05, eps=1e-6):
    """Plain-JAX reference mirroring the PyTorch forward."""
    xs = jax.nn.sigmoid(x)
    xs_pos = xs
    xs_neg = 1.0 - xs
    if clip is not None and clip > 0:
        xs_neg = jnp.minimum(xs_neg + clip, 1.0)
    los_pos = y * jnp.log(jnp.maximum(xs_pos, eps))
    los_neg = (1.0 - y) * jnp.log(jnp.maximum(xs_neg, eps))
    loss = los_pos + los_neg
    if gamma_neg > 0 or gamma_pos > 0:
        pt = xs_pos * y + xs_neg * (1.0 - y)
        gamma = gamma_pos * y + gamma_neg * (1.0 - y)
        loss = loss * jnp.power(1.0 - pt, gamma)
    return -jnp.sum(loss)


if __name__ == "__main__":
    key = jax.random.PRNGKey(0)
    kx, ky = jax.random.split(key)

    # Small multi-label problem: 16 samples, 32 classes.
    B, C = 16, 32
    x = jax.random.normal(kx, (B, C), dtype=jnp.float32) * 2.0
    y = (jax.random.uniform(ky, (B, C)) < 0.3).astype(jnp.float32)

    loss = jax.block_until_ready(asymmetric_loss(x, y))
    ref = _reference(x, y)
    assert jnp.allclose(loss, ref, rtol=1e-4, atol=1e-4), (loss, ref)

    # Second, non-aligned shape to exercise multi-step accumulation + tail masking.
    k2x, k2y = jax.random.split(jax.random.PRNGKey(1))
    B2, C2 = 48, 100
    x2 = jax.random.normal(k2x, (B2, C2), dtype=jnp.float32)
    y2 = (jax.random.uniform(k2y, (B2, C2)) < 0.3).astype(jnp.float32)
    loss2 = jax.block_until_ready(asymmetric_loss(x2, y2, block_rows=8))
    ref2 = _reference(x2, y2)
    assert jnp.allclose(loss2, ref2, rtol=1e-4, atol=1e-4), (loss2, ref2)

    print("KERNEL_OK")
</pallas_src>

<mosaic_0001>
module attributes {stable_mosaic.version = 11 : i64} {
  func.func @_asl_kernel(%arg0: i32, %arg1: i32, %arg2: memref<8x128xf32, #tpu.memory_space<vmem>>, %arg3: memref<8x128xf32, #tpu.memory_space<vmem>>, %arg4: memref<8x128xf32, #tpu.memory_space<vmem>>, %arg5: memref<8x128xf32, #tpu.memory_space<vmem>>) attributes {dimension_semantics = [#tpu.dimension_semantics<parallel>, #tpu.dimension_semantics<arbitrary>], iteration_bounds = array<i64: 2, 1>, scalar_prefetch = 0 : i64, scratch_operands = 1 : i64, tpu.core_type = #tpu.core_type<tc>, window_params = [{transform_indices = @transform_0, window_bounds = array<i64: 8, 128>}, {transform_indices = @transform_1, window_bounds = array<i64: 8, 128>}, {transform_indices = @transform_2, window_bounds = array<i64: 8, 128>}]} {
    %c0_i32 = arith.constant 0 : i32
    %0 = arith.cmpi eq, %arg1, %c0_i32 : i32
    %1 = arith.extui %0 : i1 to i32
    %c0_i32_0 = arith.constant 0 : i32
    %2 = arith.cmpi ne, %1, %c0_i32_0 : i32
    scf.if %2 {
      %cst_18 = arith.constant 0.000000e+00 : f32
      %50 = vector.broadcast %cst_18 : f32 to vector<8x128xf32>
      %c0_19 = arith.constant 0 : index
      %c0_20 = arith.constant 0 : index
      %51 = vector.load %arg5[%c0_19, %c0_20] : memref<8x128xf32, #tpu.memory_space<vmem>>, vector<8x128xf32>
      tpu.vector_store %arg5[%c0_19, %c0_20], %50 {strides = array<i32>} : memref<8x128xf32, #tpu.memory_space<vmem>>, vector<8x128xf32>,
    } else {
    }
    %c0 = arith.constant 0 : index
    %c0_1 = arith.constant 0 : index
    %3 = vector.load %arg2[%c0, %c0_1] : memref<8x128xf32, #tpu.memory_space<vmem>>, vector<8x128xf32>
    %c0_2 = arith.constant 0 : index
    %c0_3 = arith.constant 0 : index
    %4 = vector.load %arg3[%c0_2, %c0_3] : memref<8x128xf32, #tpu.memory_space<vmem>>, vector<8x128xf32>
    %5 = arith.negf %3 : vector<8x128xf32>
    %6 = math.exp %5 : vector<8x128xf32>
    %cst = arith.constant 1.000000e+00 : f32
    %7 = vector.broadcast %cst : f32 to vector<8x128xf32>
    %8 = arith.addf %7, %6 : vector<8x128xf32>
    %9 = arith.divf %7, %8 : vector<8x128xf32>
    %cst_4 = arith.constant 1.000000e+00 : f32
    %10 = vector.broadcast %cst_4 : f32 to vector<8x128xf32>
    %11 = arith.subf %10, %9 : vector<8x128xf32>
    %cst_5 = arith.constant 5.000000e-02 : f32
    %12 = vector.broadcast %cst_5 : f32 to vector<8x128xf32>
    %13 = arith.addf %11, %12 : vector<8x128xf32>
    %cst_6 = arith.constant 1.000000e+00 : f32
    %14 = vector.broadcast %cst_6 : f32 to vector<8x128xf32>
    %15 = arith.minimumf %13, %14 : vector<8x128xf32>
    %cst_7 = arith.constant 5.000000e-01 : f32
    %16 = vector.broadcast %cst_7 : f32 to vector<8x128xf32>
    %17 = arith.cmpf ogt, %4, %16 : vector<8x128xf32>
    %18 = arith.select %17, %9, %15 : vector<8x128xi1>, vector<8x128xf32>
    %cst_8 = arith.constant 9.99999997E-7 : f32
    %19 = vector.broadcast %cst_8 : f32 to vector<8x128xf32>
    %20 = arith.maximumf %18, %19 : vector<8x128xf32>
    %21 = math.log %20 : vector<8x128xf32>
    %cst_9 = arith.constant 1.000000e+00 : f32
    %22 = vector.broadcast %cst_9 : f32 to vector<8x128xf32>
    %23 = arith.subf %22, %18 : vector<8x128xf32>
    %24 = arith.mulf %23, %23 : vector<8x128xf32>
    %25 = arith.mulf %24, %24 : vector<8x128xf32>
    %26 = arith.select %17, %23, %25 : vector<8x128xi1>, vector<8x128xf32>
    %27 = arith.mulf %21, %26 : vector<8x128xf32>
    %c1_i32 = arith.constant 1 : i32
    %28 = arith.muli %arg0, %c1_i32 : i32
    %29 = arith.addi %28, %arg1 : i32
    %c1024_i32 = arith.constant 1024 : i32
    %30 = arith.muli %29, %c1024_i32 : i32
    %31 = tpu.iota {dimensions = array<i32: 0>} : vector<8x128xi32>
    %32 = tpu.iota {dimensions = array<i32: 1>} : vector<8x128xi32>
    %c128_i32 = arith.constant 128 : i32
    %33 = vector.broadcast %c128_i32 : i32 to vector<8x128xi32>
    %34 = arith.muli %31, %33 : vector<8x128xi32>
    %35 = vector.broadcast %30 : i32 to vector<8x128xi32>
    %36 = arith.addi %35, %34 : vector<8x128xi32>
    %37 = arith.addi %36, %32 : vector<8x128xi32>
    %c512_i32 = arith.constant 512 : i32
    %38 = vector.broadcast %c512_i32 : i32 to vector<8x128xi32>
    %39 = arith.cmpi slt, %37, %38 : vector<8x128xi32>
    %cst_10 = arith.constant 0.000000e+00 : f32
    %40 = vector.broadcast %cst_10 : f32 to vector<8x128xf32>
    %41 = arith.select %39, %27, %40 : vector<8x128xi1>, vector<8x128xf32>
    %c0_11 = arith.constant 0 : index
    %c0_12 = arith.constant 0 : index
    %42 = vector.load %arg5[%c0_11, %c0_12] : memref<8x128xf32, #tpu.memory_space<vmem>>, vector<8x128xf32>
    %43 = vector.shape_cast %41 : vector<8x128xf32> to vector<1x8x128xf32>
    %cst_13 = arith.constant dense<0.000000e+00> : vector<8x128xf32>
    %44 = vector.multi_reduction <add>, %43, %cst_13 [0] : vector<1x8x128xf32> to vector<8x128xf32>
    %45 = arith.addf %42, %44 : vector<8x128xf32>
    %c0_14 = arith.constant 0 : index
    %c0_15 = arith.constant 0 : index
    %46 = vector.load %arg5[%c0_14, %c0_15] : memref<8x128xf32, #tpu.memory_space<vmem>>, vector<8x128xf32>
    tpu.vector_store %arg5[%c0_14, %c0_15], %45 {strides = array<i32>} : memref<8x128xf32, #tpu.memory_space<vmem>>, vector<8x128xf32>,
    %c0_i32_16 = arith.constant 0 : i32
    %47 = arith.cmpi eq, %arg1, %c0_i32_16 : i32
    %48 = arith.extui %47 : i1 to i32
    %c0_i32_17 = arith.constant 0 : i32
    %49 = arith.cmpi ne, %48, %c0_i32_17 : i32
    scf.if %49 {
      %c0_18 = arith.constant 0 : index
      %c0_19 = arith.constant 0 : index
      %50 = vector.load %arg5[%c0_18, %c0_19] : memref<8x128xf32, #tpu.memory_space<vmem>>, vector<8x128xf32>
      %cst_20 = arith.constant 0.000000e+00 : f32
      %51 = vector.broadcast %cst_20 : f32 to vector<8x128xf32>
      %52 = arith.subf %51, %50 : vector<8x128xf32>
      %c0_21 = arith.constant 0 : index
      %c0_22 = arith.constant 0 : index
      %53 = vector.load %arg4[%c0_21, %c0_22] : memref<8x128xf32, #tpu.memory_space<vmem>>, vector<8x128xf32>
      tpu.vector_store %arg4[%c0_21, %c0_22], %52 {strides = array<i32>} : memref<8x128xf32, #tpu.memory_space<vmem>>, vector<8x128xf32>,
    } else {
    }
    return
  }
  func.func @transform_0(%arg0: i32, %arg1: i32) -> (i32, i32) {
    %c1_i32 = arith.constant 1 : i32
    %0 = arith.muli %arg0, %c1_i32 : i32
    %1 = arith.addi %0, %arg1 : i32
    %c0_i32 = arith.constant 0 : i32
    %c0_i32_0 = arith.constant 0 : i32
    return %1, %c0_i32 : i32, i32
  }
  func.func @transform_1(%arg0: i32, %arg1: i32) -> (i32, i32) {
    %c1_i32 = arith.constant 1 : i32
    %0 = arith.muli %arg0, %c1_i32 : i32
    %1 = arith.addi %0, %arg1 : i32
    %c0_i32 = arith.constant 0 : i32
    %c0_i32_0 = arith.constant 0 : i32
    return %1, %c0_i32 : i32, i32
  }
  func.func @transform_2(%arg0: i32, %arg1: i32) -> (i32, i32) {
    %c0_i32 = arith.constant 0 : i32
    %c0_i32_0 = arith.constant 0 : i32
    return %arg0, %c0_i32 : i32, i32
  }
}

</mosaic_0001>

<bundles_post_ra>
// kernel: tpu_custom_call.1
= control target key start
LH: loop header
LB: loop body
LE: loop exit
PB: predicated region body
PF: predicated region fallthrough
CT: control target
= control target key end

     0   :  { %7 = vsyncpa [#allocation4], 0  ;;  %s866_s0 = inlined_call_operand.hbm [shape: f32[16,128], index: 0, kind: input, shape index: {}]   ;;  %s867_s1 = inlined_call_operand.hbm [shape: f32[16,128], index: 1, kind: input, shape index: {}]   ;;  %s868_s2 = inlined_call_operand.hbm [shape: f32[16,128], index: 2, kind: output, shape index: {}]  }
   0x1   :  { %9 = vsyncpa [#allocation4 + $0x1], 0 }
   0x2   :  { %10 = vsyncpa [#allocation7], 0 }
   0x3   :  { %12 = vsyncpa [#allocation7 + $0x1], 0 }
   0x4   :  { %13 = vsyncpa [#allocation5], 0 }
   0x5   :  { %15 = vsyncpa [#allocation5 + $0x1], 0  ;;  %s638_s9 = smov 0   ;;  %s640_s10 = smov 0  }
   0x6   :  { %s642_s11 = smov 0   ;;  %s644_s12 = smov 0  }
   0x7   :  { %s646_s13 = smov 0   ;;  %s648_s14 = smov 0  }
   0x8 LB: > { %s381_s15 = sadd.s32 4294967295, %s618_s14   ;;  %s382_s16 = sadd.s32 4294967294, %s618_s14   ;;  %s618_s14 = sphi %s648_s14, %s21_s14   ;;  %s614_s13 = sphi %s646_s13, %s888_s13   ;;  %s610_s12 = sphi %s644_s12, %s887_s12   ;;  %s606_s11 = sphi %s642_s11, %s886_s11   ;;  %s602_s10 = sphi %s640_s10, %s885_s10   ;;  %s598_s9 = sphi %s638_s9, %s884_s9  }
   0x9   : > { %s33_s17 = sadd.s32 1, %s614_s13  ;;  %s42_s18 = sadd.s32 1, %s606_s11 }
   0xa   : > { %p35_p0 = scmp.ge.s32.totalorder %s33_s17, 2  ;;  %p49_p1 = scmp.ne.s32.totalorder %s606_s11, %s602_s10 }
   0xb   : > { %p50_p2 = scmp.eq.s32.totalorder %s618_s14, 0  ;;  %p55_p3 = scmp.ne.s32.totalorder %s602_s10, %s598_s9 }
   0xc   : > { %s890_s17 = smov (%p35_p0, %s33_s17), 0  ;;  %p56_p5 = scmp.eq.s32.totalorder %s381_s15, 0 }
   0xd   : > { %p679_p4 = por %p50_p2, %p49_p1  ;;  %s39_s20 = ssub.s32 %s614_s13, %s890_s17 }
   0xe   : > { %p107_p6 = scmp.eq.s32.totalorder %s381_s15, 1  ;;  %p40_p7 = scmp.eq.s32.totalorder %s39_s20, 0 }
   0xf   : > { %p685_p8 = por %p56_p5, %p55_p3  ;;  %p113_p10 = scmp.eq.s32.totalorder %s382_s16, 1 }
  0x10   : > { %p689_p9 = por %p107_p6, %p49_p1  ;;  %p416_p13 = scmp.lt.s32.totalorder %s618_s14, 2 }
  0x11   : > { %s872_s21 = scalar_select %p685_p8, 1, 0 }
  0x12   : > { %s873_s22 = scalar_select %p689_p9, 1, 0 }
  0x13   : > { %s694_s23 = scalar_select %p40_p7, %s606_s11, %s42_s18  }
  0x14   : > { %p696_p11 = por %p113_p10, %p55_p3  ;;  %s703_s25 = sand.u32 1, %s606_s11  }
  0x15   : > { %s385_s26 = sshll.u32 %s703_s25, 3  ;;  %s386_s27 = sshll.u32 %s614_s13, 7 }
  0x16   : > { %s874_s24 = scalar_select %p696_p11, 1, 0 }
  0x17   : > { %s712_s30 = scalar_lea.hbm %s866_s0, %s386_s27  ;;  %s137_s3 = scalar_lea.vmem [#allocation3], %s385_s26 }
  0x18   : > { %s145_s4 = sshll.u32 %s137_s3, 4  ;;  %p720_p0 = pnand %p416_p13, %p679_p4  ;;  %s716_s4 = int_to_ptr.vmem [resolvable:$true] %s145_s4 }
  0x19   : > { %s134_s6 = scalar_lea.sflag [#allocation4], %s703_s25  ;;  %s472_s7 = scalar_lea.hbm %s712_s30, 128 }
  0x1a   : > { %p473_p3 = scmp.ne.s32.totalorder %s712_s30, %s472_s7  ;;  %p474_p5 = pneg %p720_p0 }
  0x1b   : > { %s477_s16 = scalar_lea.hbm %s866_s0, 256  ;;  %p478_p4 = scmp.lt.u32.totalorder %s712_s30, %s866_s0 }
  0x1c   : > { %p475_p6 = pnand %p474_p5, %p473_p3  ;;  %p479_p10 = scmp.lt.u32.totalorder %s477_s16, %s472_s7 }
  0x1d   : > { %p481_p12 = scmp.lt.u32.totalorder %s472_s7, %s712_s30 }
  0x1e   : > { %p476_p7 = pneg %p475_p6  ;;  %p480_p13 = por %p479_p10, %p478_p4 }
  0x20   : > { %p482_p1 = por %p481_p12, %p480_p13 }
  0x22   : > { %p483_p2 = pnand %p482_p1, %p476_p7 }
  0x24   : > { %486 = shalt.err (!%p483_p2)
}
  0x25   : > { %s487_s20 = scalar_lea.vmem %s716_s4, 128  ;;  %s620_s28 = smov [#allocation3]  }
  0x26   : > { %p488_p3 = scmp.ne.s32.totalorder %s716_s4, %s487_s20  ;;  %s492_s29 = sshll.u32 %s620_s28, 4  ;;  %s493_s29 = int_to_ptr.vmem [resolvable:$false] %s492_s29 }
  0x27   : > { %s494_s3 = scalar_lea.vmem %s493_s29, 256  ;;  %p495_p9 = scmp.lt.s32.totalorder %s716_s4, %s493_s29 }
  0x28   : > { %p490_p6 = pnand %p488_p3, %p474_p5  ;;  %p496_p4 = scmp.lt.s32.totalorder %s494_s3, %s487_s20 }
  0x2a   : > { %p491_p11 = pneg %p490_p6  ;;  %p497_p10 = por %p496_p4, %p495_p9 }
  0x2c   : > { %p498_p12 = pnand %p497_p10, %p491_p11 }
  0x2e   : > { %501 = shalt.err (!%p498_p12)
}
  0x2f   : > { %408 = dma.hbm_to_vmem [thread:$0]  (!%p720_p0), %s712_s30, 128, %s716_s4, %s134_s6  }
  0x30   : > { %p876_p1 = scmp.lt.s32.totalorder %s618_s14, 3  ;;  %p877_p2 = scmp.ge.s32.totalorder %s618_s14, 1 }
  0x31   : > { %s765_s16 = scalar_lea.hbm %s867_s1, %s386_s27  ;;  %s156_s18 = scalar_lea.vmem [#allocation6], %s385_s26 }
  0x32   : > { %p756_p7 = pnand %p877_p2, %p876_p1  ;;  %s164_s19 = sshll.u32 %s156_s18, 4  ;;  %s165_s19 = int_to_ptr.vmem [resolvable:$true] %s164_s19 }
  0x33   : > { %s153_s30 = scalar_lea.sflag [#allocation7], %s703_s25  ;;  %s502_s4 = scalar_lea.hbm %s765_s16, 128 }
  0x34   : > { %s878_s7 = scalar_select %p756_p7, 1, 0 }
  0x35   : > { %p503_p9 = scmp.ne.s32.totalorder %s765_s16, %s502_s4  ;;  %s507_s27 = scalar_lea.hbm %s867_s1, 256 }
  0x36   : > { %p508_p3 = scmp.lt.u32.totalorder %s765_s16, %s867_s1  ;;  %p509_p6 = scmp.lt.u32.totalorder %s507_s27, %s502_s4 }
  0x37   : > { %p505_p11 = pnand %p503_p9, %p474_p5  ;;  %p511_p10 = scmp.lt.u32.totalorder %s502_s4, %s765_s16 }
  0x38   : > { %p510_p4 = por %p509_p6, %p508_p3 }
  0x39   : > { %p506_p13 = pneg %p505_p11 }
  0x3a   : > { %p512_p12 = por %p511_p10, %p510_p4 }
  0x3c   : > { %p513_p1 = pnand %p512_p12, %p506_p13 }
  0x3e   : > { %516 = shalt.err (!%p513_p1)
}
  0x3f   : > { %s517_s25 = scalar_lea.vmem %s165_s19, 128  ;;  %s621_s26 = smov [#allocation6]  }
  0x40   : > { %p518_p2 = scmp.ne.s32.totalorder %s165_s19, %s517_s25  ;;  %s522_s3 = sshll.u32 %s621_s26, 4  ;;  %s523_s3 = int_to_ptr.vmem [resolvable:$false] %s522_s3 }
  0x41   : > { %s524_s8 = scalar_lea.vmem %s523_s3, 256  ;;  %p525_p8 = scmp.lt.s32.totalorder %s165_s19, %s523_s3 }
  0x42   : > { %p520_p9 = pnand %p518_p2, %p474_p5  ;;  %p526_p7 = scmp.lt.s32.totalorder %s524_s8, %s517_s25 }
  0x44   : > { %p521_p11 = pneg %p520_p9  ;;  %p527_p3 = por %p526_p7, %p525_p8 }
  0x46   : > { %p528_p6 = pnand %p527_p3, %p521_p11 }
  0x48   : > { %531 = shalt.err (!%p528_p6)
}
  0x49   : > { %411 = dma.hbm_to_vmem [thread:$0]  (!%p720_p0), %s765_s16, 128, %s165_s19, %s153_s30  }
  0x4a   : > { %p879_p13 = scmp.ne.s32.totalorder %s878_s7, 0 }
  0x4b   : > { %s792_s15 = sand.u32 (!%p879_p13), 1, %s602_s10   ;;  %p880_p8 = scmp.ne.s32.totalorder (!%p879_p13), %s872_s21, 0 }
  0x4c   : > { %173 = sbr.rel (%p879_p13) target bundleno = 154 (0x9a), region = 28  ;;  %s795_s18 = sshll.u32 (!%p879_p13), %s792_s15, 3 }
  0x4d   : > { %s176_s4 = scalar_lea.sflag (!%p879_p13), [#allocation4], %s792_s15  ;;  %s179_s6 = scalar_lea.vmem (!%p879_p13), [#allocation3], %s795_s18 }
  0x53   : > { %585 = dma.done.wait (%p880_p8), %s176_s4, 128  }
  0x54   : > { %587 = vsyncadd (%p880_p8), %s176_s4, 4294967168  ;;  %s185_s5 = scalar_lea.sflag [#allocation7], %s792_s15  ;;  %s188_s7 = scalar_lea.vmem [#allocation6], %s795_s18 }
  0x55   : > { %589 = dma.done.wait (%p880_p8), %s185_s5, 128  }
  0x56   : > { %591 = vsyncadd (%p880_p8), %s185_s5, 4294967168  ;;  %v221_v0 = vld [vmem:[%s179_s6] sm:$0xff]  ;;  %v222_v5 = vld [vmem:[%s188_s7] sm:$0xff]  ;;  %v244_v7 = vlaneseq  ;;  %s394_s21 = sshll.u32 %s610_s12, 10  ;;  %s213_s16 = scalar_lea.vmem [#allocation8], %s795_s18 }
  0x57   : > { %v393_v1 = vmul.f32 -1.442695, %v221_v0  ;;  %vm232_vm0 = vcmp.gt.f32.partialorder %v222_v5, 0.5  ;;  %v249_v15 = vstv %s394_s21  ;;  %s278_s19 = sshll.u32 %s213_s16, 4  ;;  %s396_s30 = sshll.u32 %s610_s12, 7  ;;  %s814_s19 = int_to_ptr.vmem [resolvable:$true] %s278_s19 }
  0x58   : > { %v245_v10 = vshrl.u32 %v244_v7, 7  ;;  %v247_v17 = vand.u32 127, %v244_v7  ;;  %s819_s28 = scalar_lea.hbm %s868_s2, %s396_s30  ;;  %s265_s29 = scalar_lea.sflag [#allocation5], %s792_s15 }
  0x59   : > { %466 = vpow2.f32 %v393_v1  ;;  %s532_s25 = scalar_lea.vmem %s814_s19, 128  ;;  %p881_p5 = scmp.ne.s32.totalorder %s873_s22, 0 }
  0x5a   : > { %v248_v14 = vmul.u32 128, %v245_v10  ;;  %p533_p0 = scmp.ne.s32.totalorder %s814_s19, %s532_s25  ;;  %s622_s12 = smov [#allocation8]  }
  0x5b   : > { %s536_s26 = sshll.u32 %s622_s12, 4  ;;  %s537_s26 = int_to_ptr.vmem [resolvable:$false] %s536_s26 }
  0x5c   : > { %v250_v18 = vadd.s32 %v249_v15, %v248_v14  ;;  %p534_p7 = pnand %p533_p0, %p881_p5  ;;  %s538_s3 = scalar_lea.vmem %s537_s26, 256 }
  0x5d   : > { %p539_p10 = scmp.lt.s32.totalorder %s814_s19, %s537_s26  ;;  %p540_p12 = scmp.lt.s32.totalorder %s538_s3, %s532_s25 }
  0x5e   : > { %v251_v20 = vadd.s32 %v250_v18, %v247_v17  ;;  %p535_p4 = pneg %p534_p7 }
  0x5f   : > { %p541_p1 = por %p540_p12, %p539_p10 }
  0x60   : > { %vm252_vm1 = vcmp.lt.s32.totalorder %v251_v20, 512 }
  0x61   : > { %p542_p2 = pnand %p541_p1, %p535_p4 }
  0x63   : > { %v467_v2 = vpop.eup %466 }
  0x64   : > { %v226_v3 = vadd.f32 1.0, %v467_v2 }
  0x66   : > { %468 = vrcp.f32 %v226_v3 }
  0x70   : > { %v469_v4 = vpop.eup %468 }
  0x71   : > { %v229_v6 = vsub.f32 1.0, %v469_v4 }
  0x73   : > { %v230_v8 = vadd.f32 0.05, %v229_v6 }
  0x75   : > { %v231_v9 = vmin.f32 %v230_v8, 1.0 }
  0x77   : > { %v233_v11 = vsel %vm232_vm0, %v469_v4, %v231_v9 }
  0x78   : > { %v234_v12 = vmax.f32 %v233_v11, 1e-06  ;;  %v237_v13 = vsub.f32 1.0, %v233_v11 }
  0x7a   : > { %470 = vlog2.f32 %v234_v12  ;;  %v238_v16 = vmul.f32 %v237_v13, %v237_v13 }
  0x7c   : > { %v239_v19 = vmul.f32 %v238_v16, %v238_v16 }
  0x7e   : > { %v240_v22 = vsel %vm232_vm0, %v237_v13, %v239_v19 }
  0x84   : > { %v471_v21 = vpop.eup %470 }
  0x85   : > { %v236_v23 = vmul.f32 0.6931472, %v471_v21 }
  0x87   : > { %v241_v24 = vmul.f32 %v240_v22, %v236_v23 }
  0x89   : > { %v253_v25 = vsel %vm252_vm1, %v241_v24, 0.0 }
  0x8a   : > { %v262_v26 = vsub.f32 0.0, %v253_v25 }
  0x8c   : > { %263 = vst [vmem:[%s213_s16] sm:$0xff] %v262_v26 }
  0x8d   : > { %545 = shalt.err (!%p542_p2)
}
  0x8e   : > { %s546_s8 = scalar_lea.hbm %s819_s28, 128  ;;  %s550_s4 = scalar_lea.hbm %s868_s2, 256 }
  0x8f   : > { %p547_p9 = scmp.ne.s32.totalorder %s819_s28, %s546_s8  ;;  %p551_p6 = scmp.lt.u32.totalorder %s819_s28, %s868_s2 }
  0x90   : > { %p552_p13 = scmp.lt.u32.totalorder %s550_s4, %s546_s8  ;;  %p554_p0 = scmp.lt.u32.totalorder %s546_s8, %s819_s28 }
  0x91   : > { %p548_p11 = pnand %p547_p9, %p881_p5 }
  0x92   : > { %p553_p8 = por %p552_p13, %p551_p6 }
  0x93   : > { %p549_p3 = pneg %p548_p11 }
  0x94   : > { %p555_p7 = por %p554_p0, %p553_p8 }
  0x96   : > { %p556_p4 = pnand %p555_p7, %p549_p3 }
  0x98   : > { %559 = shalt.err (!%p556_p4)
}
  0x99   : > { %403 = dma.vmem_to_hbm [thread:$0]  (%p881_p5), %s814_s19, 128, %s819_s28, %s265_s29  }
  0x9a PF: > { %s290_s7 = sand.u32 1, %s598_s9   ;;  %p882_p10 = scmp.ne.s32.totalorder %s874_s24, 0 }
  0x9b   : > { %p883_p12 = scmp.ge.s32.totalorder %s618_s14, 2  ;;  %s291_s21 = scalar_lea.sflag [#allocation5], %s290_s7 }
  0x9d   : > { %p413_p1 = pnand %p883_p12, %p882_p10 }
  0x9f   : > { %593 = dma.done.wait (!%p413_p1), %s291_s21, 128  }
  0xa0   : > { %595 = vsyncadd (!%p413_p1), %s291_s21, 4294967168  ;;  %s21_s14 = sadd.s32 1, %s618_s14   ;;  %s884_s9 = smov %s602_s10 }
  0xa1   : > { %p18_p2 = scmp.ge.s32.totalorder %s21_s14, 4   ;;  %s885_s10 = smov %s606_s11 }
  0xa2   : > { %s886_s11 = smov %s694_s23  ;;  %s887_s12 = smov %s614_s13 }
  0xa3   : > { %s888_s13 = smov %s890_s17  ;;  %20 = sbr.rel (!%p18_p2) target bundleno = 8 (0x8), region = 94 }
  0xaa   :  { %296 = vsyncpa [#allocation4], 1 }
  0xab   :  { %298 = vsyncpa [#allocation4 + $0x1], 1 }
  0xac   :  { %299 = vsyncpa [#allocation7], 1 }
  0xad   :  { %301 = vsyncpa [#allocation7 + $0x1], 1 }
  0xae   :  { %302 = vsyncpa [#allocation5], 1 }
  0xaf   :  { %304 = vsyncpa [#allocation5 + $0x1], 1 }

</bundles_post_ra>
